<compile_context>
chip_gen: v5e
topology: v5e:2x2
jax: 0.10.0
libtpu: 0.0.40
codegen_flags: <defaults>
</compile_context>

<pallas_src>
import functools
import math

import jax
import jax.numpy as jnp
from jax.experimental import pallas as pl
from jax.experimental.pallas import tpu as pltpu


def _mha_kernel(x_ref, wqkv_ref, bqkv_ref, wo_ref, bo_ref, o_ref, *,
                num_heads, seqs, seq_len):
    """One grid step = all `seqs` time-sequences of one sample.

    x_ref : (1, C, seqs*seq_len)  channel-major tile straight from the NCHW input
    o_ref : (1, C, seqs*seq_len)  written back channel-major (NCHW layout)
    """
    x_cm = x_ref[0]                               # (C, M), M = seqs*seq_len
    x = x_cm.T                                    # (M, C) token-major; tiny in-VMEM transpose
    M, C = x.shape
    hd = C // num_heads

    # Fused QKV projection; 1/sqrt(hd) is pre-folded into the Q columns of the weight/bias.
    qkv = jnp.dot(x, wqkv_ref[...], preferred_element_type=jnp.float32) + bqkv_ref[...]

    wo = wo_ref[...]                              # (C, C) loaded once, register/VMEM resident

    # Per-head attention, batched over the `seqs` independent sequences.  The head loop is
    # static (unrolled); head outputs are accumulated straight through the output
    # projection, so there is no concatenate and no per-sequence slicing.
    out = jnp.zeros((M, C), jnp.float32)
    for h in range(num_heads):
        qh = qkv[:, h * hd:(h + 1) * hd].reshape(seqs, seq_len, hd)
        kh = qkv[:, C + h * hd:C + (h + 1) * hd].reshape(seqs, seq_len, hd)
        vh = qkv[:, 2 * C + h * hd:2 * C + (h + 1) * hd].reshape(seqs, seq_len, hd)

        # Scores without materialising K^T (contraction over the trailing hd dim).
        s = jnp.einsum('bqd,bkd->bqk', qh, kh,
                       preferred_element_type=jnp.float32)        # (seqs, S, S)
        s = s - jnp.max(s, axis=-1, keepdims=True)
        p = jnp.exp(s)
        p = p * pl.reciprocal(jnp.sum(p, axis=-1, keepdims=True), approx=True)

        oh = jnp.einsum('bqk,bkd->bqd', p, vh,
                        preferred_element_type=jnp.float32)       # (seqs, S, hd)

        # Fold this head directly into the output projection: attn_h @ (rows of Wo^T).
        out = out + jnp.dot(oh.reshape(M, hd), wo[h * hd:(h + 1) * hd, :],
                            preferred_element_type=jnp.float32)

    out = out + bo_ref[...]
    o_ref[0] = out.T.astype(o_ref.dtype)          # back to (C, M) channel-major (NCHW)


def time_self_attention_forward(x_nchw, kernel_params, num_heads):
    """Equivalent of TimeSelfAttention.forward: NCHW in, NCHW out."""
    w_qkv_t, b_qkv, wo_t, bo = kernel_params
    N, C, H, W = x_nchw.shape
    assert C % num_heads == 0, "embed_dim must be divisible by num_heads"
    M = H * W

    # Free (metadata-only) reshape — no HBM transpose passes on either side.
    x_flat = x_nchw.reshape(N, C, M)

    kernel = functools.partial(_mha_kernel, num_heads=num_heads, seqs=H, seq_len=W)
    out_flat = pl.pallas_call(
        kernel,
        out_shape=jax.ShapeDtypeStruct((N, C, M), x_nchw.dtype),
        grid=(N,),                                # >= 2 parallel steps for v7x's 2 TCs
        in_specs=[
            pl.BlockSpec((1, C, M), lambda n: (n, 0, 0)),    # x tile (channel-major)
            pl.BlockSpec((C, 3 * C), lambda n: (0, 0)),      # fused [Wq|Wk|Wv]^T (scale folded)
            pl.BlockSpec((1, 3 * C), lambda n: (0, 0)),      # fused bias
            pl.BlockSpec((C, C), lambda n: (0, 0)),          # Wo^T
            pl.BlockSpec((1, C), lambda n: (0, 0)),          # bo
        ],
        out_specs=pl.BlockSpec((1, C, M), lambda n: (n, 0, 0)),
        compiler_params=pltpu.CompilerParams(dimension_semantics=("parallel",)),
    )(x_flat, w_qkv_t, b_qkv, wo_t, bo)

    return out_flat.reshape(N, C, H, W)


def init_params(key, embed_dim):
    """Deterministic synthetic init mirroring nn.MultiheadAttention param shapes."""
    k1, k2, k3, k4 = jax.random.split(key, 4)
    in_proj_w = jax.random.normal(k1, (3 * embed_dim, embed_dim), jnp.float32) \
        * (1.0 / math.sqrt(embed_dim))
    in_proj_b = jax.random.normal(k2, (3 * embed_dim,), jnp.float32) * 0.02
    out_proj_w = jax.random.normal(k3, (embed_dim, embed_dim), jnp.float32) \
        * (1.0 / math.sqrt(embed_dim))
    out_proj_b = jax.random.normal(k4, (embed_dim,), jnp.float32) * 0.02
    return in_proj_w, in_proj_b, out_proj_w, out_proj_b


def prepare_kernel_params(torch_params, num_heads):
    """Fuse QKV, pre-transpose weights, fold the 1/sqrt(hd) softmax scale into Q."""
    in_proj_w, in_proj_b, out_proj_w, out_proj_b = torch_params
    C = out_proj_w.shape[0]
    hd = C // num_heads
    scale = 1.0 / math.sqrt(hd)

    w_qkv_t = in_proj_w.T                          # (C, 3C) = [Wq^T | Wk^T | Wv^T]
    b_qkv = in_proj_b.reshape(1, 3 * C)
    col_scale = jnp.concatenate(
        [jnp.full((C,), scale, jnp.float32), jnp.ones((2 * C,), jnp.float32)])
    w_qkv_t = w_qkv_t * col_scale[None, :]
    b_qkv = b_qkv * col_scale[None, :]
    return w_qkv_t, b_qkv, out_proj_w.T, out_proj_b.reshape(1, C)


def reference_forward(x_nchw, torch_params, num_heads):
    """Pure-JAX reference (same math as PyTorch nn.MultiheadAttention forward)."""
    in_proj_w, in_proj_b, out_proj_w, out_proj_b = torch_params
    N, C, H, W = x_nchw.shape
    x = jnp.transpose(x_nchw, (0, 2, 3, 1)).reshape(N * H, W, C)   # (B, S, C)
    wq, wk, wv = in_proj_w[:C], in_proj_w[C:2 * C], in_proj_w[2 * C:]
    bq, bk, bv = in_proj_b[:C], in_proj_b[C:2 * C], in_proj_b[2 * C:]
    q = x @ wq.T + bq
    k = x @ wk.T + bk
    v = x @ wv.T + bv
    B, S, _ = x.shape
    hd = C // num_heads
    qh = q.reshape(B, S, num_heads, hd).transpose(0, 2, 1, 3)
    kh = k.reshape(B, S, num_heads, hd).transpose(0, 2, 1, 3)
    vh = v.reshape(B, S, num_heads, hd).transpose(0, 2, 1, 3)
    s = jnp.einsum('bhqd,bhkd->bhqk', qh, kh) / math.sqrt(hd)
    p = jax.nn.softmax(s, axis=-1)
    o = jnp.einsum('bhqk,bhkd->bhqd', p, vh)
    o = o.transpose(0, 2, 1, 3).reshape(B, S, C)
    o = o @ out_proj_w.T + out_proj_b
    return o.reshape(N, H, W, C).transpose(0, 3, 1, 2)


if __name__ == "__main__":
    N, C, H, W = 2, 32, 4, 8        # embed_dim = C = 32, time axis = W
    num_heads = 4

    key = jax.random.PRNGKey(0)
    kx, kp = jax.random.split(key)
    x = jax.random.normal(kx, (N, C, H, W), jnp.float32)

    torch_params = init_params(kp, C)
    kernel_params = prepare_kernel_params(torch_params, num_heads)

    out = time_self_attention_forward(x, kernel_params, num_heads)
    out = jax.block_until_ready(out)

    assert out.shape == (N, C, H, W), out.shape
    ref = reference_forward(x, torch_params, num_heads)
    # Tolerance accounts for the approximate EUP reciprocal in the softmax normalisation.
    if not jnp.allclose(out, ref, atol=5e-3, rtol=5e-3):
        err = float(jnp.max(jnp.abs(out - ref)))
        raise AssertionError(f"Pallas kernel output does not match reference "
                             f"(max abs err {err})")

    print("KERNEL_OK")
</pallas_src>

<mosaic_0001>
module attributes {stable_mosaic.version = 11 : i64} {
  func.func @_mha_kernel(%arg0: i32, %arg1: memref<1x32x32xf32, #tpu.memory_space<vmem>>, %arg2: memref<32x96xf32, #tpu.memory_space<vmem>>, %arg3: memref<1x96xf32, #tpu.memory_space<vmem>>, %arg4: memref<32x32xf32, #tpu.memory_space<vmem>>, %arg5: memref<1x32xf32, #tpu.memory_space<vmem>>, %arg6: memref<1x32x32xf32, #tpu.memory_space<vmem>>) attributes {dimension_semantics = [#tpu.dimension_semantics<parallel>], iteration_bounds = array<i64: 2>, scalar_prefetch = 0 : i64, scratch_operands = 0 : i64, tpu.core_type = #tpu.core_type<tc>, window_params = [{transform_indices = @transform_0, window_bounds = array<i64: 1, 32, 32>}, {pipeline_mode = #tpu.pipeline_mode<synchronous>, transform_indices = @transform_1, window_bounds = array<i64: 32, 96>}, {pipeline_mode = #tpu.pipeline_mode<synchronous>, transform_indices = @transform_2, window_bounds = array<i64: 1, 96>}, {pipeline_mode = #tpu.pipeline_mode<synchronous>, transform_indices = @transform_3, window_bounds = array<i64: 32, 32>}, {pipeline_mode = #tpu.pipeline_mode<synchronous>, transform_indices = @transform_4, window_bounds = array<i64: 1, 32>}, {transform_indices = @transform_5, window_bounds = array<i64: 1, 32, 32>}]} {
    %c0 = arith.constant 0 : index
    %c0_0 = arith.constant 0 : index
    %c0_1 = arith.constant 0 : index
    %0 = vector.load %arg1[%c0, %c0_0, %c0_1] : memref<1x32x32xf32, #tpu.memory_space<vmem>>, vector<1x32x32xf32>
    %1 = vector.shape_cast %0 : vector<1x32x32xf32> to vector<32x32xf32>
    %2 = tpu.transpose %1, [1, 0] : vector<32x32xf32> -> vector<32x32xf32>
    %c0_2 = arith.constant 0 : index
    %c0_3 = arith.constant 0 : index
    %3 = vector.load %arg2[%c0_2, %c0_3] : memref<32x96xf32, #tpu.memory_space<vmem>>, vector<32x96xf32>
    %cst = arith.constant dense<0.000000e+00> : vector<32x96xf32>
    %4 = tpu.matmul %2, %3, %cst {dimension_numbers = #tpu.dot_dimension_numbers<[1], [0], [0], [1], [0, 0, 1, 1], [], []>} : vector<32x32xf32>, vector<32x96xf32>, vector<32x96xf32> -> vector<32x96xf32>
    %c0_4 = arith.constant 0 : index
    %c0_5 = arith.constant 0 : index
    %5 = vector.load %arg3[%c0_4, %c0_5] : memref<1x96xf32, #tpu.memory_space<vmem>>, vector<1x96xf32>
    %6 = vector.broadcast %5 : vector<1x96xf32> to vector<32x96xf32>
    %7 = arith.addf %4, %6 : vector<32x96xf32>
    %c0_6 = arith.constant 0 : index
    %c0_7 = arith.constant 0 : index
    %8 = vector.load %arg4[%c0_6, %c0_7] : memref<32x32xf32, #tpu.memory_space<vmem>>, vector<32x32xf32>
    %cst_8 = arith.constant 0.000000e+00 : f32
    %9 = vector.broadcast %cst_8 : f32 to vector<32x32xf32>
    %10 = vector.extract_strided_slice %7 {offsets = [0, 0], sizes = [32, 8], strides = [1, 1]} : vector<32x96xf32> to vector<32x8xf32>
    %11 = vector.shape_cast %10 : vector<32x8xf32> to vector<4x8x8xf32>
    %12 = vector.extract_strided_slice %7 {offsets = [0, 32], sizes = [32, 8], strides = [1, 1]} : vector<32x96xf32> to vector<32x8xf32>
    %13 = vector.shape_cast %12 : vector<32x8xf32> to vector<4x8x8xf32>
    %14 = vector.extract_strided_slice %7 {offsets = [0, 64], sizes = [32, 8], strides = [1, 1]} : vector<32x96xf32> to vector<32x8xf32>
    %15 = vector.shape_cast %14 : vector<32x8xf32> to vector<4x8x8xf32>
    "tpu.trace_start"() <{level = 10 : i32, message = "bqd,bkd->bqk"}> : () -> ()
    %cst_9 = arith.constant dense<0.000000e+00> : vector<4x8x8xf32>
    %16 = tpu.matmul %11, %13, %cst_9 {dimension_numbers = #tpu.dot_dimension_numbers<[2], [2], [1], [1], [0, 0, 0, 1, 1, 1], [0], [0]>} : vector<4x8x8xf32>, vector<4x8x8xf32>, vector<4x8x8xf32> -> vector<4x8x8xf32>
    "tpu.trace_stop"() : () -> ()
    %cst_10 = arith.constant dense<0xFF800000> : vector<4x8xf32>
    %17 = vector.multi_reduction <maximumf>, %16, %cst_10 [2] : vector<4x8x8xf32> to vector<4x8xf32>
    %18 = vector.shape_cast %17 : vector<4x8xf32> to vector<4x8x1xf32>
    %19 = vector.broadcast %18 : vector<4x8x1xf32> to vector<4x8x8xf32>
    %20 = arith.subf %16, %19 : vector<4x8x8xf32>
    %21 = math.exp %20 : vector<4x8x8xf32>
    %cst_11 = arith.constant dense<0.000000e+00> : vector<4x8xf32>
    %22 = vector.multi_reduction <add>, %21, %cst_11 [2] : vector<4x8x8xf32> to vector<4x8xf32>
    %23 = vector.shape_cast %22 : vector<4x8xf32> to vector<4x8x1xf32>
    %24 = tpu.reciprocal %23 {approx = true} : vector<4x8x1xf32> -> vector<4x8x1xf32>
    %25 = vector.broadcast %24 : vector<4x8x1xf32> to vector<4x8x8xf32>
    %26 = arith.mulf %21, %25 : vector<4x8x8xf32>
    "tpu.trace_start"() <{level = 10 : i32, message = "bqk,bkd->bqd"}> : () -> ()
    %cst_12 = arith.constant dense<0.000000e+00> : vector<4x8x8xf32>
    %27 = tpu.matmul %26, %15, %cst_12 {dimension_numbers = #tpu.dot_dimension_numbers<[2], [1], [1], [2], [0, 0, 0, 1, 1, 2], [0], [0]>} : vector<4x8x8xf32>, vector<4x8x8xf32>, vector<4x8x8xf32> -> vector<4x8x8xf32>
    "tpu.trace_stop"() : () -> ()
    %28 = vector.shape_cast %27 : vector<4x8x8xf32> to vector<32x8xf32>
    %29 = vector.extract_strided_slice %8 {offsets = [0, 0], sizes = [8, 32], strides = [1, 1]} : vector<32x32xf32> to vector<8x32xf32>
    %cst_13 = arith.constant dense<0.000000e+00> : vector<32x32xf32>
    %30 = tpu.matmul %28, %29, %cst_13 {dimension_numbers = #tpu.dot_dimension_numbers<[1], [0], [0], [1], [0, 0, 1, 1], [], []>} : vector<32x8xf32>, vector<8x32xf32>, vector<32x32xf32> -> vector<32x32xf32>
    %31 = arith.addf %9, %30 : vector<32x32xf32>
    %32 = vector.extract_strided_slice %7 {offsets = [0, 8], sizes = [32, 8], strides = [1, 1]} : vector<32x96xf32> to vector<32x8xf32>
    %33 = vector.shape_cast %32 : vector<32x8xf32> to vector<4x8x8xf32>
    %34 = vector.extract_strided_slice %7 {offsets = [0, 40], sizes = [32, 8], strides = [1, 1]} : vector<32x96xf32> to vector<32x8xf32>
    %35 = vector.shape_cast %34 : vector<32x8xf32> to vector<4x8x8xf32>
    %36 = vector.extract_strided_slice %7 {offsets = [0, 72], sizes = [32, 8], strides = [1, 1]} : vector<32x96xf32> to vector<32x8xf32>
    %37 = vector.shape_cast %36 : vector<32x8xf32> to vector<4x8x8xf32>
    "tpu.trace_start"() <{level = 10 : i32, message = "bqd,bkd->bqk"}> : () -> ()
    %cst_14 = arith.constant dense<0.000000e+00> : vector<4x8x8xf32>
    %38 = tpu.matmul %33, %35, %cst_14 {dimension_numbers = #tpu.dot_dimension_numbers<[2], [2], [1], [1], [0, 0, 0, 1, 1, 1], [0], [0]>} : vector<4x8x8xf32>, vector<4x8x8xf32>, vector<4x8x8xf32> -> vector<4x8x8xf32>
    "tpu.trace_stop"() : () -> ()
    %cst_15 = arith.constant dense<0xFF800000> : vector<4x8xf32>
    %39 = vector.multi_reduction <maximumf>, %38, %cst_15 [2] : vector<4x8x8xf32> to vector<4x8xf32>
    %40 = vector.shape_cast %39 : vector<4x8xf32> to vector<4x8x1xf32>
    %41 = vector.broadcast %40 : vector<4x8x1xf32> to vector<4x8x8xf32>
    %42 = arith.subf %38, %41 : vector<4x8x8xf32>
    %43 = math.exp %42 : vector<4x8x8xf32>
    %cst_16 = arith.constant dense<0.000000e+00> : vector<4x8xf32>
    %44 = vector.multi_reduction <add>, %43, %cst_16 [2] : vector<4x8x8xf32> to vector<4x8xf32>
    %45 = vector.shape_cast %44 : vector<4x8xf32> to vector<4x8x1xf32>
    %46 = tpu.reciprocal %45 {approx = true} : vector<4x8x1xf32> -> vector<4x8x1xf32>
    %47 = vector.broadcast %46 : vector<4x8x1xf32> to vector<4x8x8xf32>
    %48 = arith.mulf %43, %47 : vector<4x8x8xf32>
    "tpu.trace_start"() <{level = 10 : i32, message = "bqk,bkd->bqd"}> : () -> ()
    %cst_17 = arith.constant dense<0.000000e+00> : vector<4x8x8xf32>
    %49 = tpu.matmul %48, %37, %cst_17 {dimension_numbers = #tpu.dot_dimension_numbers<[2], [1], [1], [2], [0, 0, 0, 1, 1, 2], [0], [0]>} : vector<4x8x8xf32>, vector<4x8x8xf32>, vector<4x8x8xf32> -> vector<4x8x8xf32>
    "tpu.trace_stop"() : () -> ()
    %50 = vector.shape_cast %49 : vector<4x8x8xf32> to vector<32x8xf32>
    %51 = vector.extract_strided_slice %8 {offsets = [8, 0], sizes = [8, 32], strides = [1, 1]} : vector<32x32xf32> to vector<8x32xf32>
    %cst_18 = arith.constant dense<0.000000e+00> : vector<32x32xf32>
    %52 = tpu.matmul %50, %51, %cst_18 {dimension_numbers = #tpu.dot_dimension_numbers<[1], [0], [0], [1], [0, 0, 1, 1], [], []>} : vector<32x8xf32>, vector<8x32xf32>, vector<32x32xf32> -> vector<32x32xf32>
    %53 = arith.addf %31, %52 : vector<32x32xf32>
    %54 = vector.extract_strided_slice %7 {offsets = [0, 16], sizes = [32, 8], strides = [1, 1]} : vector<32x96xf32> to vector<32x8xf32>
    %55 = vector.shape_cast %54 : vector<32x8xf32> to vector<4x8x8xf32>
    %56 = vector.extract_strided_slice %7 {offsets = [0, 48], sizes = [32, 8], strides = [1, 1]} : vector<32x96xf32> to vector<32x8xf32>
    %57 = vector.shape_cast %56 : vector<32x8xf32> to vector<4x8x8xf32>
    %58 = vector.extract_strided_slice %7 {offsets = [0, 80], sizes = [32, 8], strides = [1, 1]} : vector<32x96xf32> to vector<32x8xf32>
    %59 = vector.shape_cast %58 : vector<32x8xf32> to vector<4x8x8xf32>
    "tpu.trace_start"() <{level = 10 : i32, message = "bqd,bkd->bqk"}> : () -> ()
    %cst_19 = arith.constant dense<0.000000e+00> : vector<4x8x8xf32>
    %60 = tpu.matmul %55, %57, %cst_19 {dimension_numbers = #tpu.dot_dimension_numbers<[2], [2], [1], [1], [0, 0, 0, 1, 1, 1], [0], [0]>} : vector<4x8x8xf32>, vector<4x8x8xf32>, vector<4x8x8xf32> -> vector<4x8x8xf32>
    "tpu.trace_stop"() : () -> ()
    %cst_20 = arith.constant dense<0xFF800000> : vector<4x8xf32>
    %61 = vector.multi_reduction <maximumf>, %60, %cst_20 [2] : vector<4x8x8xf32> to vector<4x8xf32>
    %62 = vector.shape_cast %61 : vector<4x8xf32> to vector<4x8x1xf32>
    %63 = vector.broadcast %62 : vector<4x8x1xf32> to vector<4x8x8xf32>
    %64 = arith.subf %60, %63 : vector<4x8x8xf32>
    %65 = math.exp %64 : vector<4x8x8xf32>
    %cst_21 = arith.constant dense<0.000000e+00> : vector<4x8xf32>
    %66 = vector.multi_reduction <add>, %65, %cst_21 [2] : vector<4x8x8xf32> to vector<4x8xf32>
    %67 = vector.shape_cast %66 : vector<4x8xf32> to vector<4x8x1xf32>
    %68 = tpu.reciprocal %67 {approx = true} : vector<4x8x1xf32> -> vector<4x8x1xf32>
    %69 = vector.broadcast %68 : vector<4x8x1xf32> to vector<4x8x8xf32>
    %70 = arith.mulf %65, %69 : vector<4x8x8xf32>
    "tpu.trace_start"() <{level = 10 : i32, message = "bqk,bkd->bqd"}> : () -> ()
    %cst_22 = arith.constant dense<0.000000e+00> : vector<4x8x8xf32>
    %71 = tpu.matmul %70, %59, %cst_22 {dimension_numbers = #tpu.dot_dimension_numbers<[2], [1], [1], [2], [0, 0, 0, 1, 1, 2], [0], [0]>} : vector<4x8x8xf32>, vector<4x8x8xf32>, vector<4x8x8xf32> -> vector<4x8x8xf32>
    "tpu.trace_stop"() : () -> ()
    %72 = vector.shape_cast %71 : vector<4x8x8xf32> to vector<32x8xf32>
    %73 = vector.extract_strided_slice %8 {offsets = [16, 0], sizes = [8, 32], strides = [1, 1]} : vector<32x32xf32> to vector<8x32xf32>
    %cst_23 = arith.constant dense<0.000000e+00> : vector<32x32xf32>
    %74 = tpu.matmul %72, %73, %cst_23 {dimension_numbers = #tpu.dot_dimension_numbers<[1], [0], [0], [1], [0, 0, 1, 1], [], []>} : vector<32x8xf32>, vector<8x32xf32>, vector<32x32xf32> -> vector<32x32xf32>
    %75 = arith.addf %53, %74 : vector<32x32xf32>
    %76 = vector.extract_strided_slice %7 {offsets = [0, 24], sizes = [32, 8], strides = [1, 1]} : vector<32x96xf32> to vector<32x8xf32>
    %77 = vector.shape_cast %76 : vector<32x8xf32> to vector<4x8x8xf32>
    %78 = vector.extract_strided_slice %7 {offsets = [0, 56], sizes = [32, 8], strides = [1, 1]} : vector<32x96xf32> to vector<32x8xf32>
    %79 = vector.shape_cast %78 : vector<32x8xf32> to vector<4x8x8xf32>
    %80 = vector.extract_strided_slice %7 {offsets = [0, 88], sizes = [32, 8], strides = [1, 1]} : vector<32x96xf32> to vector<32x8xf32>
    %81 = vector.shape_cast %80 : vector<32x8xf32> to vector<4x8x8xf32>
    "tpu.trace_start"() <{level = 10 : i32, message = "bqd,bkd->bqk"}> : () -> ()
    %cst_24 = arith.constant dense<0.000000e+00> : vector<4x8x8xf32>
    %82 = tpu.matmul %77, %79, %cst_24 {dimension_numbers = #tpu.dot_dimension_numbers<[2], [2], [1], [1], [0, 0, 0, 1, 1, 1], [0], [0]>} : vector<4x8x8xf32>, vector<4x8x8xf32>, vector<4x8x8xf32> -> vector<4x8x8xf32>
    "tpu.trace_stop"() : () -> ()
    %cst_25 = arith.constant dense<0xFF800000> : vector<4x8xf32>
    %83 = vector.multi_reduction <maximumf>, %82, %cst_25 [2] : vector<4x8x8xf32> to vector<4x8xf32>
    %84 = vector.shape_cast %83 : vector<4x8xf32> to vector<4x8x1xf32>
    %85 = vector.broadcast %84 : vector<4x8x1xf32> to vector<4x8x8xf32>
    %86 = arith.subf %82, %85 : vector<4x8x8xf32>
    %87 = math.exp %86 : vector<4x8x8xf32>
    %cst_26 = arith.constant dense<0.000000e+00> : vector<4x8xf32>
    %88 = vector.multi_reduction <add>, %87, %cst_26 [2] : vector<4x8x8xf32> to vector<4x8xf32>
    %89 = vector.shape_cast %88 : vector<4x8xf32> to vector<4x8x1xf32>
    %90 = tpu.reciprocal %89 {approx = true} : vector<4x8x1xf32> -> vector<4x8x1xf32>
    %91 = vector.broadcast %90 : vector<4x8x1xf32> to vector<4x8x8xf32>
    %92 = arith.mulf %87, %91 : vector<4x8x8xf32>
    "tpu.trace_start"() <{level = 10 : i32, message = "bqk,bkd->bqd"}> : () -> ()
    %cst_27 = arith.constant dense<0.000000e+00> : vector<4x8x8xf32>
    %93 = tpu.matmul %92, %81, %cst_27 {dimension_numbers = #tpu.dot_dimension_numbers<[2], [1], [1], [2], [0, 0, 0, 1, 1, 2], [0], [0]>} : vector<4x8x8xf32>, vector<4x8x8xf32>, vector<4x8x8xf32> -> vector<4x8x8xf32>
    "tpu.trace_stop"() : () -> ()
    %94 = vector.shape_cast %93 : vector<4x8x8xf32> to vector<32x8xf32>
    %95 = vector.extract_strided_slice %8 {offsets = [24, 0], sizes = [8, 32], strides = [1, 1]} : vector<32x32xf32> to vector<8x32xf32>
    %cst_28 = arith.constant dense<0.000000e+00> : vector<32x32xf32>
    %96 = tpu.matmul %94, %95, %cst_28 {dimension_numbers = #tpu.dot_dimension_numbers<[1], [0], [0], [1], [0, 0, 1, 1], [], []>} : vector<32x8xf32>, vector<8x32xf32>, vector<32x32xf32> -> vector<32x32xf32>
    %97 = arith.addf %75, %96 : vector<32x32xf32>
    %c0_29 = arith.constant 0 : index
    %c0_30 = arith.constant 0 : index
    %98 = vector.load %arg5[%c0_29, %c0_30] : memref<1x32xf32, #tpu.memory_space<vmem>>, vector<1x32xf32>
    %99 = vector.broadcast %98 : vector<1x32xf32> to vector<32x32xf32>
    %100 = arith.addf %97, %99 : vector<32x32xf32>
    %101 = tpu.transpose %100, [1, 0] : vector<32x32xf32> -> vector<32x32xf32>
    %c0_31 = arith.constant 0 : index
    %c0_32 = arith.constant 0 : index
    %c0_33 = arith.constant 0 : index
    %102 = vector.load %arg6[%c0_31, %c0_32, %c0_33] : memref<1x32x32xf32, #tpu.memory_space<vmem>>, vector<1x32x32xf32>
    %103 = vector.shape_cast %102 : vector<1x32x32xf32> to vector<32x32xf32>
    %104 = vector.shape_cast %101 : vector<32x32xf32> to vector<1x32x32xf32>
    tpu.vector_store %arg6[%c0_31, %c0_32, %c0_33], %104 {strides = array<i32>} : memref<1x32x32xf32, #tpu.memory_space<vmem>>, vector<1x32x32xf32>,
    return
  }
  func.func @transform_0(%arg0: i32) -> (i32, i32, i32) {
    %c0_i32 = arith.constant 0 : i32
    %c0_i32_0 = arith.constant 0 : i32
    %c0_i32_1 = arith.constant 0 : i32
    return %arg0, %c0_i32, %c0_i32_0 : i32, i32, i32
  }
  func.func @transform_1(%arg0: i32) -> (i32, i32) {
    %c0_i32 = arith.constant 0 : i32
    %c0_i32_0 = arith.constant 0 : i32
    %c0_i32_1 = arith.constant 0 : i32
    return %c0_i32, %c0_i32_0 : i32, i32
  }
  func.func @transform_2(%arg0: i32) -> (i32, i32) {
    %c0_i32 = arith.constant 0 : i32
    %c0_i32_0 = arith.constant 0 : i32
    %c0_i32_1 = arith.constant 0 : i32
    return %c0_i32, %c0_i32_0 : i32, i32
  }
  func.func @transform_3(%arg0: i32) -> (i32, i32) {
    %c0_i32 = arith.constant 0 : i32
    %c0_i32_0 = arith.constant 0 : i32
    %c0_i32_1 = arith.constant 0 : i32
    return %c0_i32, %c0_i32_0 : i32, i32
  }
  func.func @transform_4(%arg0: i32) -> (i32, i32) {
    %c0_i32 = arith.constant 0 : i32
    %c0_i32_0 = arith.constant 0 : i32
    %c0_i32_1 = arith.constant 0 : i32
    return %c0_i32, %c0_i32_0 : i32, i32
  }
  func.func @transform_5(%arg0: i32) -> (i32, i32, i32) {
    %c0_i32 = arith.constant 0 : i32
    %c0_i32_0 = arith.constant 0 : i32
    %c0_i32_1 = arith.constant 0 : i32
    return %arg0, %c0_i32, %c0_i32_0 : i32, i32, i32
  }
}

</mosaic_0001>

<bundles_post_ra>
// kernel: tpu_custom_call.1
= control target key start
LH: loop header
LB: loop body
LE: loop exit
PB: predicated region body
PF: predicated region fallthrough
CT: control target
= control target key end

     0   :  { %10 = vsyncpa [#allocation3], 0  ;;  %s2591_s0 = inlined_call_operand.hbm [shape: f32[2,32,32], index: 0, kind: input, shape index: {}]   ;;  %s2592_s1 = inlined_call_operand.hbm [shape: f32[32,96], index: 1, kind: input, shape index: {}]   ;;  %s2593_s2 = inlined_call_operand.vmem [shape: f32[1,96], index: 2, kind: input, shape index: {}]   ;;  %s2594_s3 = inlined_call_operand.hbm [shape: f32[32,32], index: 3, kind: input, shape index: {}]   ;;  %s2595_s4 = inlined_call_operand.vmem [shape: f32[1,32], index: 4, kind: input, shape index: {}]   ;;  %s2596_s5 = inlined_call_operand.hbm [shape: f32[2,32,32], index: 5, kind: output, shape index: {}]  }
   0x1   :  { %12 = vsyncpa [#allocation3 + $0x1], 0 }
   0x2   :  { %13 = vsyncpa [#allocation6], 0 }
   0x3   :  { %14 = vsyncpa [#allocation4], 0 }
   0x4   :  { %16 = vsyncpa [#allocation4 + $0x1], 0  ;;  %s2201_s18 = smov 0   ;;  %s2203_s19 = smov 0  }
   0x5   :  { %s2205_s20 = smov 0   ;;  %s2207_s21 = smov 0  }
   0x6 LB: > { %s2222_s22 = sadd.s32 4294967295, %s2152_s21   ;;  %s1729_s23 = sadd.s32 4294967294, %s2152_s21   ;;  %s2152_s21 = sphi %s2207_s21, %s2608_s21   ;;  %s2148_s20 = sphi %s2205_s20, %s2607_s20   ;;  %s2144_s19 = sphi %s2203_s19, %s2606_s19   ;;  %s2140_s18 = sphi %s2201_s18, %s2605_s18  }
   0x7   : > { %p42_p0 = scmp.ne.s32.totalorder %s2144_s19, %s2140_s18  ;;  %p43_p1 = scmp.eq.s32.totalorder %s2222_s22, 0 }
   0x8   : > { %p150_p2 = scmp.eq.s32.totalorder %s2222_s22, 1  ;;  %p156_p3 = scmp.eq.s32.totalorder %s1729_s23, 1 }
   0x9   : > { %p2231_p4 = por %p43_p1, %p42_p0  ;;  %p1730_p5 = scmp.ge.s32.totalorder %s2152_s21, 1 }
   0xa   : > { %p2236_p6 = por %p156_p3, %p42_p0  ;;  %p163_p7 = scmp.lt.s32.totalorder %s2152_s21, 3 }
   0xb   : > { %s174_s28 = sshll.u32 %s2592_s1, 4  ;;  %s2154_s30 = smov [#allocation5]   ;;  %s175_s28 = int_to_ptr.hbm [resolvable:$true] %s174_s28 }
   0xc   : > { %p2244_p8 = pnand %p1730_p5, %p163_p7  ;;  %s176_s6 = sshll.u32 %s2154_s30, 4  ;;  %s177_s6 = int_to_ptr.vmem [resolvable:$true] %s176_s6 }
   0xd   : > { %s191_s9 = sshll.u32 %s2594_s3, 4  ;;  %s2597_s10 = smov 128   ;;  %s192_s9 = int_to_ptr.hbm [resolvable:$true] %s191_s9 }
   0xe   : > { %p1830_p9 = pneg %p2244_p8  ;;  %s2156_s11 = smov 8  }
   0xf   : > { %s2157_s12 = smov [#allocation7]   ;;  %s2263_s14 = sadd.s32 1, %s2152_s21  }
  0x10   : > { %p1831_p10 = pnand %p1830_p9, %p43_p1  ;;  %s193_s13 = sshll.u32 %s2157_s12, 4  ;;  %s194_s13 = int_to_ptr.vmem [resolvable:$true] %s193_s13 }
  0x11   : > { %s29_s15 = sadd.s32 1, %s2148_s20  ;;  %s26_s16 = ssub.s32 %s2152_s21, %s2263_s14 }
  0x12   : > { %1833 = dma.hbm_to_vmem [thread:$0]  (!%p1831_p10), %s175_s28, 512, %s177_s6, [#allocation6], %s2597_s10, %s2597_s10, %s2156_s11  }
  0x13   : > { %1836 = dma.hbm_to_vmem [thread:$0]  (!%p1831_p10), %s192_s9, 512, %s194_s13, [#allocation6], %s2597_s10, %s2597_s10, %s2156_s11  }
  0x14   : > { %p36_p12 = scmp.ne.s32.totalorder %s2148_s20, %s2144_s19  ;;  %p27_p13 = scmp.eq.s32.totalorder %s26_s16, 0 }
  0x15   : > { %p37_p0 = scmp.eq.s32.totalorder %s2152_s21, 0  ;;  %p1847_p5 = scmp.lt.s32.totalorder %s2152_s21, 2 }
  0x16   : > { %p2273_p3 = por %p150_p2, %p36_p12  ;;  %s210_s26 = sand.u32 1, %s2148_s20  }
  0x17   : > { %s2279_s23 = scalar_select %p27_p13, %s2148_s20, %s29_s15  }
  0x18   : > { %p38_p7 = por %p37_p0, %p36_p12  ;;  %s1734_s27 = sshll.u32 %s210_s26, 5 }
  0x19   : > { %s1815_s28 = sshll.u32 %s2152_s21, 5  ;;  %s214_s8 = scalar_lea.vmem [#allocation2], %s1734_s27 }
  0x1a   : > { %s219_s7 = scalar_lea.hbm %s2591_s0, %s1815_s28  ;;  %s222_s9 = sshll.u32 %s214_s8, 4  ;;  %s223_s9 = int_to_ptr.vmem [resolvable:$true] %s222_s9 }
  0x1b   : > { %s220_s12 = sshll.u32 %s219_s7, 4  ;;  %p2286_p2 = pnand %p1847_p5, %p38_p7  ;;  %s221_s12 = int_to_ptr.hbm [resolvable:$true] %s220_s12 }
  0x1c   : > { %s211_s15 = scalar_lea.sflag [#allocation3], %s210_s26  ;;  %s2052_s16 = sshra.s32 %s221_s12, 4  ;;  %s2053_s16 = int_to_ptr.hbm [resolvable:$true] %s2052_s16 }
  0x1d   : > { %s2054_s10 = scalar_lea.hbm %s2053_s16, 32  ;;  %p2056_p10 = pneg %p2286_p2 }
  0x1e   : > { %p2055_p9 = scmp.ne.s32.totalorder %s2053_s16, %s2054_s10  ;;  %s2059_s30 = scalar_lea.hbm %s2591_s0, 64 }
  0x1f   : > { %p2060_p0 = scmp.lt.s32.totalorder %s2053_s16, %s2591_s0  ;;  %p2061_p5 = scmp.lt.s32.totalorder %s2059_s30, %s2054_s10 }
  0x20   : > { %p2057_p12 = pnand %p2056_p10, %p2055_p9 }
  0x21   : > { %p2062_p7 = por %p2061_p5, %p2060_p0 }
  0x22   : > { %p2058_p13 = pneg %p2057_p12 }
  0x24   : > { %p2063_p11 = pnand %p2062_p7, %p2058_p13 }
  0x26   : > { %2066 = shalt.err (!%p2063_p11)
}
  0x27   : > { %s2603_s26 = smov 128   ;;  %234 = sbr.rel (%p2244_p8) target bundleno = 2564 (0xa04), region = 40 }
  0x28   : > { %1840 = dma.hbm_to_vmem [thread:$0]  (!%p2286_p2), %s221_s12, 512, %s223_s9, %s211_s15, %s2603_s26, %s2603_s26, %s2156_s11  }
  0x29   : > { %s2306_s8 = sand.u32 (!%p2244_p8), 1, %s2144_s19  }
  0x2a   : > { %s1738_s10 = sshll.u32 (!%p2244_p8), %s2306_s8, 5  ;;  %s237_s16 = scalar_lea.sflag (!%p2244_p8), [#allocation3], %s2306_s8 }
  0x2b   : > { %s240_s28 = scalar_lea.vmem (!%p2244_p8), [#allocation2], %s1738_s10 }
  0x2c   : > { %2127 = dma.done.wait (%p2231_p4), %s237_s16, 512  }
  0x2d   : > { %2129 = vsyncadd (%p2231_p4), %s237_s16, 4294966784 }
  0x2e   : > { %2131 = dma.done.wait (%p43_p1), [#allocation6], 1024  }
  0x2f   : > { %2133 = vsyncadd (%p43_p1), [#allocation6], 4294966272  ;;  %v278_v0 = vld [vmem:[%s240_s28] sm:$0xff]  ;;  %v317_v1 = vld [vmem:[#allocation5 + $0x18] sm:$0xff]  ;;  %vm322_vm0 = vcmask 261120   ;;  %s2158_s11 = smov 96  }
  0x30   : > { %282 = vxpose.xlu0.b32.start [1/4] (short) (narrow) %v278_v0, 32  ;;  %v316_v2 = vld [vmem:[#allocation5 + $0x10] sm:$0xff]  ;;  %347 = vmatpush.msra.mxu0 %v317_v1  ;;  %v315_v3 = vld [vmem:[#allocation5 + $0x8] sm:$0xff]  ;;  %v314_v4 = vld [vmem:[#allocation5] sm:$0xff]  ;;  %vm371_vm1 = vcmask 64512   ;;  %s2159_s9 = smov 120  }
  0x31   : > { %v279_v5 = vld [vmem:[%s240_s28 + $0x8] sm:$0xff]  ;;  %v280_v6 = vld [vmem:[%s240_s28 + $0x10] sm:$0xff]  ;;  %v281_v7 = vld [vmem:[%s240_s28 + $0x18] sm:$0xff]  ;;  %s2160_s12 = smov 64   ;;  %s2161_s13 = smov 88  }
  0x32   : > { %348 = vmatpush.msra.mxu0 %v316_v2  ;;  %v1926_v13 = vld [vmem:[%s2593_s2] ss:$0 sm:$0xff]  ;;  %s2162_s15 = smov 56   ;;  %s2163_s27 = smov 80  }
  0x33   : > { %s2164_s30 = smov 112   ;;  %s2165_s6 = smov 72  }
  0x34   : > { %349 = vmatpush.msra.mxu0 %v315_v3  ;;  %s2166_s7 = smov 48   ;;  %s2167_s26 = smov 104  }
  0x35   : > { %s2168_s16 = smov 40   ;;  %s277_s29 = scalar_lea.vmem [#allocation8], %s1738_s10 }
  0x36   : > { %350 = vmatpush.msra.mxu0 %v314_v4  ;;  %s1622_s10 = scalar_lea.sflag [#allocation4], %s2306_s8 }
  0x38   : > { %283 = vxpose.xlu0.b32.cont [2/4] (short) (narrow) %v279_v5, 32 }
  0x40   : > { %284 = vxpose.xlu0.b32.cont [3/4] (short) (narrow) %v280_v6, 32 }
  0x48   : > { %285 = vxpose.xlu0.b32.end [4/4] (short) (narrow) %v281_v7, 32 }
  0xd4   : > { %v298_v8 = vpop.trf.xlu0 }
  0xd5   : > { %1742 = vmatmul.msk.f32.vlgmr.msra.gmra.mxu0 %vm322_vm0, %v298_v8 }
  0xdc   : > { %v299_v9 = vpop.trf.xlu0 }
  0xdd   : > { %1743 = vmatmul.msk.f32.gmra.mxu0 %vm322_vm0, %v299_v9 }
  0xe4   : > { %v300_v10 = vpop.trf.xlu0 }
  0xe5   : > { %1744 = vmatmul.msk.f32.gmra.mxu0 %vm322_vm0, %v300_v10 }
  0xec   : > { %v301_v11 = vpop.trf.xlu0 }
  0xed   : > { %1745 = vmatmul.msk.f32.gmra.mxu0 %vm322_vm0, %v301_v11 }
 0x152   : > { %v352_v12 = vpop.f32.mrf.mxu0 }
 0x153   : > { %v2330_v17 = vadd.f32 %v1926_v13, %v352_v12 }
 0x15a   : > { %v355_v14 = vpop.f32.mrf.mxu0 }
 0x15b   : > { %v2327_v15 = vadd.f32 %v1926_v13, %v355_v14 }
 0x15d   : > { %397 = vrot.lane.b32.xlu1 %v2327_v15, %s2158_s11  ;;  %v2355_v30 = vpack.i.bf16 %v2330_v17, %v2327_v15 }
 0x162   : > { %v358_v16 = vpop.f32.mrf.mxu0 }
 0x163   : > { %v2332_v18 = vadd.f32 %v1926_v13, %v358_v16 }
 0x165   : > { %369 = vrot.lane.b32.xlu1 %v2330_v17, %s2158_s11 }
 0x16a   : > { %v361_v19 = vpop.f32.mrf.mxu0 }
 0x16b   : > { %v2335_v20 = vadd.f32 %v1926_v13, %v361_v19 }
 0x16d   : > { %451 = vrot.lane.b32.xlu2 %v2335_v20, %s2158_s11 }
 0x1c7   : > { %v452_v22 = vpop.permute.xlu2 %451 }
 0x1cf   : > { %v398_v21 = vpop.permute.xlu1 %397 }
 0x1d0   : > { %1748 = vmatpush.xpose.msk.msra.mxu3 %vm371_vm1, %v398_v21 }
 0x1d3   : > { %1749 = vmatmul.msk.f32.vlgmr.msra.gmra.mxu3 %vm371_vm1, %v2327_v15 }
 0x1d7   : > { %v370_v23 = vpop.permute.xlu1 %369 }
 0x1d8   : > { %1746 = vmatpush.xpose.msk.msra.mxu1 %vm371_vm1, %v370_v23 }
 0x1db   : > { %1747 = vmatmul.msk.f32.vlgmr.msra.gmra.mxu1 %vm371_vm1, %v2330_v17 }
 0x1dc   : > { %1752 = vmatpush.xpose.msk.msrb.mxu1 %vm371_vm1, %v452_v22  ;;  %v2406_v22 = vpack.i.bf16 %v2332_v18, %v2335_v20 }
 0x1e3   : > { %1753 = vmatmul.msk.f32.vlgmr.msrb.gmra.mxu1 %vm371_vm1, %v2335_v20 }
 0x256   : > { %v420_v24 = vpop.f32.mrf.mxu3 }
 0x257   : > { %v480_v25 = vsel %vm371_vm1, %v420_v24, -inf }
 0x258   : > { %v393_v26 = vpop.f32.mrf.mxu1  ;;  %481 = vmax.xlane.f32.xlu2 %v480_v25 }
 0x259   : > { %v477_v27 = vsel %vm371_vm1, %v393_v26, -inf }
 0x25a   : > { %478 = vmax.xlane.f32.xlu1 %v477_v27 }
 0x260   : > { %v474_v28 = vpop.f32.mrf.mxu1 }
 0x261   : > { %v486_v29 = vsel %vm371_vm1, %v474_v28, -inf }
 0x262   : > { %487 = vmax.xlane.f32.xlu0 %v486_v29 }
 0x270   : > { %424 = vrot.lane.b32.xlu2 %v2332_v18, %s2158_s11  ;;  %s1816_s11 = sshll.u32 %s2222_s22, 5 }
 0x273   : > { %625 = vrot.lane.b32.xlu1 %v2330_v17, %s2159_s9 }
 0x278   : > { %1902 = vrot.lane.b32.xlu2 %v2355_v30, %s2160_s12 }
 0x280   : > { %627 = vrot.lane.b32.xlu2 %v2330_v17, %s2161_s13 }
 0x288   : > { %599 = vrot.lane.b32.xlu2 %v2335_v20, %s2160_s12 }
 0x290   : > { %711 = vrot.lane.b32.xlu2 %v2335_v20, %s2161_s13 }
 0x298   : > { %683 = vrot.lane.b32.xlu2 %v2332_v18, %s2161_s13 }
 0x2a0   : > { %681 = vrot.lane.b32.xlu2 %v2332_v18, %s2159_s9 }
 0x2cb   : > { %v482_v31 = vpop.xlane.xlu2 %481 }
 0x2cc   : > { %v490_v34 = vsub.f32 %v420_v24, %v482_v31 }
 0x2cd   : > { %v479_v32 = vpop.xlane.xlu1 %478 }
 0x2ce   : > { %v489_v33 = vsub.f32 %v393_v26, %v479_v32  ;;  %v495_v37 = vmul.f32 1.442695, %v490_v34 }
 0x2d0   : > { %v493_v35 = vmul.f32 1.442695, %v489_v33 }
 0x2d2   : > { %1928 = vpow2.f32 %v493_v35 }
 0x2d3   : > { %v425_v36 = vpop.permute.xlu2 %424  ;;  %1930 = vpow2.f32 %v495_v37 }
 0x2d4   : > { %1750 = vmatpush.xpose.msk.msrb.mxu3 %vm371_vm1, %v425_v36 }
 0x2d5   : > { %v488_v38 = vpop.xlane.xlu0 %487 }
 0x2d6   : > { %v492_v40 = vsub.f32 %v474_v28, %v488_v38 }
 0x2d7   : > { %1751 = vmatmul.msk.f32.vlgmr.msrb.gmra.mxu3 %vm371_vm1, %v2332_v18 }
 0x2d8   : > { %v1929_v39 = vpop.eup %1928  ;;  %v499_v43 = vmul.f32 1.442695, %v492_v40 }
 0x2d9   : > { %v501_v41 = vsel %vm371_vm1, %v1929_v39, 0.0  ;;  %v1931_v46 = vpop.eup %1930 }
 0x2da   : > { %502 = vadd.xlane.f32.xlu1 %v501_v41  ;;  %1932 = vpow2.f32 %v499_v43  ;;  %v504_v47 = vsel %vm371_vm1, %v1931_v46, 0.0 }
 0x2db   : > { %v1903_v42 = vpop.permute.xlu2 %1902 }
 0x2dc   : > { %v1904_v44 = vunpack.i.l.bf16 %v1903_v42  ;;  %v1905_v45 = vunpack.i.h.bf16 %v1903_v42 }
 0x2de   : > { %542 = vmatpush.msra.mxu2 %v1905_v45  ;;  %568 = vmatpush.msra.mxu3 %v1904_v44 }
 0x2e0   : > { %v1933_v49 = vpop.eup %1932 }
 0x2e1   : > { %v510_v50 = vsel %vm371_vm1, %v1933_v49, 0.0 }
 0x2e2   : > { %505 = vadd.xlane.f32.xlu1 %v504_v47 }
 0x2e3   : > { %v628_v48 = vpop.permute.xlu2 %627 }
 0x2e4   : > { %1758 = vmatpush.xpose.msk.msrb.mxu3 %vm371_vm1, %v628_v48 }
 0x2e5   : > { %v626_v52 = vpop.permute.xlu1 %625 }
 0x2ea   : > { %511 = vadd.xlane.f32.xlu1 %v510_v50 }
 0x2eb   : > { %v600_v51 = vpop.permute.xlu2 %599 }
 0x2ec   : > { %620 = vmatpush.msrb.mxu2 %v600_v51 }
 0x2f3   : > { %v712_v53 = vpop.permute.xlu2 %711 }
 0x2fb   : > { %v684_v58 = vpop.permute.xlu2 %683 }
 0x303   : > { %709 = vrot.lane.b32.xlu1 %v2335_v20, %s2159_s9  ;;  %v682_v2 = vpop.permute.xlu2 %681 }
 0x34d   : > { %v503_v54 = vpop.xlane.xlu1 %502 }
 0x34e   : > { %1934 = vrcp.f32 %v503_v54 }
 0x354   : > { %v1935_v55 = vpop.eup %1934 }
 0x355   : > { %v506_v56 = vpop.xlane.xlu1 %505  ;;  %v517_v57 = vmul.f32 %v1935_v55, %v1929_v39 }
 0x356   : > { %1936 = vrcp.f32 %v506_v56 }
 0x357   : > { %1754 = vmatmul.msk.f32.vlgmr.msra.gmra.mxu2 %vm371_vm1, %v517_v57 }
 0x358   : > { %1762 = vmatpush.xpose.msk.msra.mxu2 %vm371_vm1, %v684_v58 }
 0x35a   : > { %v447_v59 = vpop.f32.mrf.mxu3 }
 0x35b   : > { %v483_v60 = vsel %vm371_vm1, %v447_v59, -inf }
 0x35c   : > { %v1937_v61 = vpop.eup %1936  ;;  %484 = vmax.xlane.f32.xlu1 %v483_v60 }
 0x35d   : > { %v518_v62 = vmul.f32 %v1937_v61, %v1931_v46  ;;  %v512_v63 = vpop.xlane.xlu1 %511 }
 0x35e   : > { %1938 = vrcp.f32 %v512_v63 }
 0x35f   : > { %1755 = vmatmul.msk.f32.vlgmr.msra.gmra.mxu3 %vm371_vm1, %v518_v62 }
 0x360   : > { %1764 = vmatpush.xpose.msk.msra.mxu3 %vm371_vm1, %v712_v53 }
 0x364   : > { %v1939_v0 = vpop.eup %1938 }
 0x365   : > { %v520_v1 = vmul.f32 %v1939_v0, %v1933_v49 }
 0x367   : > { %1757 = vmatmul.msk.f32.vlgmr.msrb.gmra.mxu2 %vm371_vm1, %v520_v1  ;;  %1759 = vmatmul.msk.f32.vlgmr.msrb.gmra.mxu3 %vm371_vm1, %v626_v52 }
 0x36f   : > { %1763 = vmatmul.msk.f32.vlgmr.msra.gmra.mxu2 %vm371_vm1, %v682_v2 }
 0x375   : > { %v710_v3 = vpop.permute.xlu1 %709  ;;  %573 = vrot.lane.b32.xlu1 %v2332_v18, %s2160_s12 }
 0x376   : > { %1765 = vmatmul.msk.f32.vlgmr.msra.gmra.mxu3 %vm371_vm1, %v710_v3 }
 0x3cf   : > { %v485_v4 = vpop.xlane.xlu1 %484 }
 0x3d0   : > { %v491_v5 = vsub.f32 %v447_v59, %v485_v4 }
 0x3d2   : > { %v497_v6 = vmul.f32 1.442695, %v491_v5 }
 0x3d4   : > { %1940 = vpow2.f32 %v497_v6 }
 0x3da   : > { %v1941_v7 = vpop.eup %1940  ;;  %v2390_v9 = vpop.f32.mrf.mxu2 }
 0x3db   : > { %v507_v8 = vsel %vm371_vm1, %v1941_v7, 0.0 }
 0x3dc   : > { %508 = vadd.xlane.f32.xlu0 %v507_v8 }
 0x3e2   : > { %v2392_v10 = vpop.f32.mrf.mxu3 }
 0x3e7   : > { %v574_v11 = vpop.permute.xlu1 %573 }
 0x3e8   : > { %594 = vmatpush.msra.mxu1 %v574_v11 }
 0x3ea   : > { %v2394_v12 = vpop.f32.mrf.mxu2  ;;  %v2396_v13 = vpop.f32.mrf.mxu3 }
 0x3f2   : > { %v706_v14 = vpop.f32.mrf.mxu2 }
 0x3f3   : > { %v743_v16 = vsel %vm371_vm1, %v706_v14, -inf }
 0x3f4   : > { %744 = vmax.xlane.f32.xlu0 %v743_v16 }
 0x3f9   : > { %v734_v19 = vpop.f32.mrf.mxu3 }
 0x3fa   : > { %v746_v21 = vsel %vm371_vm1, %v734_v19, -inf }
 0x3fb   : > { %747 = vmax.xlane.f32.xlu2 %v746_v21 }
 0x408   : > { %655 = vrot.lane.b32.xlu0 %v2327_v15, %s2161_s13  ;;  %s1633_s13 = scalar_lea.hbm %s2596_s5, %s1816_s11 }
 0x413   : > { %653 = vrot.lane.b32.xlu2 %v2327_v15, %s2159_s9 }
 0x41b   : > { %1907 = vrot.lane.b32.xlu2 %v2406_v22, %s2162_s15 }
 0x423   : > { %997 = vrot.lane.b32.xlu2 %v2327_v15, %s2163_s27 }
 0x42b   : > { %969 = vrot.lane.b32.xlu2 %v2330_v17, %s2163_s27 }
 0x433   : > { %995 = vrot.lane.b32.xlu2 %v2327_v15, %s2164_s30 }
 0x43b   : > { %967 = vrot.lane.b32.xlu2 %v2330_v17, %s2164_s30 }
 0x443   : > { %1051 = vrot.lane.b32.xlu2 %v2335_v20, %s2164_s30 }
 0x44b   : > { %1023 = vrot.lane.b32.xlu2 %v2332_v18, %s2164_s30 }
 0x44f   : > { %v509_v23 = vpop.xlane.xlu0 %508 }
 0x450   : > { %1942 = vrcp.f32 %v509_v23 }
 0x456   : > { %v1943_v24 = vpop.eup %1942 }
 0x457   : > { %v519_v25 = vmul.f32 %v1943_v24, %v1941_v7 }
 0x459   : > { %1756 = vmatmul.msk.f32.vlgmr.msra.gmra.mxu1 %vm371_vm1, %v519_v25 }
 0x467   : > { %v745_v26 = vpop.xlane.xlu0 %744 }
 0x468   : > { %v751_v27 = vsub.f32 %v706_v14, %v745_v26 }
 0x46a   : > { %v757_v28 = vmul.f32 1.442695, %v751_v27 }
 0x46c   : > { %1944 = vpow2.f32 %v757_v28 }
 0x46e   : > { %v748_v29 = vpop.xlane.xlu2 %747 }
 0x46f   : > { %v752_v31 = vsub.f32 %v734_v19, %v748_v29 }
 0x471   : > { %v759_v32 = vmul.f32 1.442695, %v752_v31 }
 0x472   : > { %v1945_v33 = vpop.eup %1944 }
 0x473   : > { %1946 = vpow2.f32 %v759_v32  ;;  %v767_v34 = vsel %vm371_vm1, %v1945_v33, 0.0 }
 0x474   : > { %768 = vadd.xlane.f32.xlu1 %v767_v34  ;;  %v364_v34 = vld [vmem:[#allocation7] sm:$0xff] }
 0x476   : > { %v654_v35 = vpop.permute.xlu2 %653 }
 0x479   : > { %v1947_v36 = vpop.eup %1946 }
 0x47a   : > { %v656_v37 = vpop.permute.xlu0 %655  ;;  %v770_v38 = vsel %vm371_vm1, %v1947_v36, 0.0 }
 0x47b   : > { %1760 = vmatpush.xpose.msk.msrb.mxu1 %vm371_vm1, %v656_v37  ;;  %771 = vadd.xlane.f32.xlu0 %v770_v38 }
 0x47e   : > { %1761 = vmatmul.msk.f32.vlgmr.msrb.gmra.mxu1 %vm371_vm1, %v654_v35  ;;  %v1908_v39 = vpop.permute.xlu2 %1907 }
 0x47f   : > { %v1910_v40 = vunpack.i.h.bf16 %v1908_v39  ;;  %v1909_v41 = vunpack.i.l.bf16 %v1908_v39 }
 0x481   : > { %854 = vmatpush.msrb.mxu3 %v1910_v40  ;;  %880 = vmatpush.msrb.mxu0 %v1909_v41 }
 0x486   : > { %v998_v42 = vpop.permute.xlu2 %997 }
 0x487   : > { %1780 = vmatpush.xpose.msk.msra.mxu0 %vm371_vm1, %v998_v42 }
 0x48d   : > { %1025 = vrot.lane.b32.xlu1 %v2332_v18, %s2163_s27 }
 0x48e   : > { %v970_v43 = vpop.permute.xlu2 %969 }
 0x48f   : > { %1053 = vrot.lane.b32.xlu0 %v2335_v20, %s2163_s27  ;;  %1778 = vmatpush.xpose.msk.msra.mxu3 %vm371_vm1, %v970_v43  ;;  %s1636_s27 = sshll.u32 %s1633_s13, 4  ;;  %s1637_s27 = int_to_ptr.hbm [resolvable:$true] %s1636_s27 }
 0x490   : > { %s2096_s30 = sshra.s32 %s1637_s27, 4  ;;  %s2097_s30 = int_to_ptr.hbm [resolvable:$true] %s2096_s30 }
 0x491   : > { %p2103_p11 = scmp.lt.s32.totalorder %s2097_s30, %s2596_s5 }
 0x496   : > { %v996_v44 = vpop.permute.xlu2 %995 }
 0x49e   : > { %v968_v47 = vpop.permute.xlu2 %967 }
 0x4a6   : > { %v1052_v53 = vpop.permute.xlu2 %1051 }
 0x4ae   : > { %v1024_v58 = vpop.permute.xlu2 %1023 }
 0x4d6   : > { %v2430_v50 = vpop.f32.mrf.mxu1 }
 0x4e7   : > { %v769_v45 = vpop.xlane.xlu1 %768 }
 0x4e8   : > { %1948 = vrcp.f32 %v769_v45 }
 0x4ee   : > { %v1949_v46 = vpop.eup %1948  ;;  %v772_v48 = vpop.xlane.xlu0 %771 }
 0x4ef   : > { %v779_v49 = vmul.f32 %v1949_v46, %v1945_v33  ;;  %1950 = vrcp.f32 %v772_v48 }
 0x4f1   : > { %1768 = vmatmul.msk.f32.vlgmr.msrb.gmra.mxu3 %vm371_vm1, %v779_v49 }
 0x4f5   : > { %v1951_v51 = vpop.eup %1950 }
 0x4f6   : > { %v780_v52 = vmul.f32 %v1951_v51, %v1947_v36 }
 0x4f8   : > { %1769 = vmatmul.msk.f32.vlgmr.msrb.gmra.mxu0 %vm371_vm1, %v780_v52 }
 0x4f9   : > { %1779 = vmatmul.msk.f32.vlgmr.msra.gmra.mxu3 %vm371_vm1, %v968_v47 }
 0x4fb   : > { %v678_v54 = vpop.f32.mrf.mxu1 }
 0x4fc   : > { %v740_v55 = vsel %vm371_vm1, %v678_v54, -inf }
 0x4fd   : > { %741 = vmax.xlane.f32.xlu2 %v740_v55 }
 0x4ff   : > { %v1026_v56 = vpop.permute.xlu1 %1025 }
 0x500   : > { %1781 = vmatmul.msk.f32.vlgmr.msra.gmra.mxu0 %vm371_vm1, %v996_v44  ;;  %1782 = vmatpush.xpose.msk.msrb.mxu3 %vm371_vm1, %v1026_v56 }
 0x501   : > { %v1054_v57 = vpop.permute.xlu0 %1053 }
 0x502   : > { %1784 = vmatpush.xpose.msk.msrb.mxu0 %vm371_vm1, %v1054_v57 }
 0x503   : > { %1783 = vmatmul.msk.f32.vlgmr.msrb.gmra.mxu3 %vm371_vm1, %v1024_v58 }
 0x508   : > { %1785 = vmatmul.msk.f32.vlgmr.msrb.gmra.mxu0 %vm371_vm1, %v1052_v53 }
 0x570   : > { %v742_v59 = vpop.xlane.xlu2 %741 }
 0x571   : > { %v750_v60 = vsub.f32 %v678_v54, %v742_v59 }
 0x573   : > { %v755_v61 = vmul.f32 1.442695, %v750_v60 }
 0x574   : > { %v2442_v63 = vpop.f32.mrf.mxu3 }
 0x575   : > { %1952 = vpow2.f32 %v755_v61  ;;  %v2440_v62 = vpop.f32.mrf.mxu0 }
 0x57b   : > { %v1953_v0 = vpop.eup %1952 }
 0x57c   : > { %v764_v1 = vsel %vm371_vm1, %v1953_v0, 0.0  ;;  %v992_v4 = vpop.f32.mrf.mxu3 }
 0x57d   : > { %765 = vadd.xlane.f32.xlu1 %v764_v1  ;;  %v1020_v2 = vpop.f32.mrf.mxu0  ;;  %v1079_v5 = vsel %vm371_vm1, %v992_v4, -inf }
 0x57e   : > { %v1082_v3 = vsel %vm371_vm1, %v1020_v2, -inf }
 0x57f   : > { %1083 = vmax.xlane.f32.xlu0 %v1082_v3 }
 0x585   : > { %1080 = vmax.xlane.f32.xlu1 %v1079_v5  ;;  %v1076_v6 = vpop.f32.mrf.mxu0 }
 0x586   : > { %v1088_v7 = vsel %vm371_vm1, %v1076_v6, -inf  ;;  %v1048_v8 = vpop.f32.mrf.mxu3 }
 0x587   : > { %1089 = vmax.xlane.f32.xlu2 %v1088_v7  ;;  %v1085_v11 = vsel %vm371_vm1, %v1048_v8, -inf }
 0x593   : > { %1274 = vrot.lane.b32.xlu0 %v2330_v17, %s2165_s6 }
 0x59e   : > { %1912 = vrot.lane.b32.xlu1 %v2355_v30, %s2166_s7  ;;  %v737_v30 = vsel %vm371_vm1, %v2396_v13, -inf }
 0x59f   : > { %807 = vrot.lane.b32.xlu2 %v2327_v15, %s2162_s15 }
 0x5a6   : > { %1358 = vrot.lane.b32.xlu1 %v2335_v20, %s2165_s6 }
 0x5a7   : > { %1917 = vrot.lane.b32.xlu2 %v2406_v22, %s2166_s7 }
 0x5af   : > { %1272 = vrot.lane.b32.xlu2 %v2330_v17, %s2167_s26 }
 0x5b7   : > { %1330 = vrot.lane.b32.xlu2 %v2332_v18, %s2165_s6 }
 0x5bd   : > { %1086 = vmax.xlane.f32.xlu0 %v1085_v11 }
 0x5bf   : > { %1356 = vrot.lane.b32.xlu2 %v2335_v20, %s2167_s26 }
 0x5d1   : > { %1328 = vrot.lane.b32.xlu0 %v2332_v18, %s2167_s26 }
 0x5e8   : > { %738 = vmax.xlane.f32.xlu2 %v737_v30 }
 0x5f0   : > { %v766_v14 = vpop.xlane.xlu1 %765 }
 0x5f2   : > { %v1084_v16 = vpop.xlane.xlu0 %1083 }
 0x5f3   : > { %v1092_v19 = vsub.f32 %v1020_v2, %v1084_v16 }
 0x5f5   : > { %v1097_v21 = vmul.f32 1.442695, %v1092_v19 }
 0x5f7   : > { %1954 = vpow2.f32 %v1097_v21 }
 0x5f8   : > { %v1081_v22 = vpop.xlane.xlu1 %1080  ;;  %1956 = vrcp.f32 %v766_v14 }
 0x5f9   : > { %v1091_v23 = vsub.f32 %v992_v4, %v1081_v22 }
 0x5fa   : > { %v1090_v24 = vpop.xlane.xlu2 %1089 }
 0x5fb   : > { %v1095_v25 = vmul.f32 1.442695, %v1091_v23  ;;  %v1094_v26 = vsub.f32 %v1076_v6, %v1090_v24 }
 0x5fd   : > { %v1955_v27 = vpop.eup %1954  ;;  %1958 = vpow2.f32 %v1095_v25  ;;  %v1101_v28 = vmul.f32 1.442695, %v1094_v26 }
 0x5fe   : > { %v1106_v29 = vsel %vm371_vm1, %v1955_v27, 0.0  ;;  %v1957_v31 = vpop.eup %1956 }
 0x5ff   : > { %1960 = vpow2.f32 %v1101_v28  ;;  %1107 = vadd.xlane.f32.xlu0 %v1106_v29  ;;  %v778_v32 = vmul.f32 %v1957_v31, %v1953_v0 }
 0x602   : > { %v808_v33 = vpop.permute.xlu2 %807 }
 0x603   : > { %v1959_v35 = vpop.eup %1958  ;;  %828 = vmatpush.msrb.mxu2 %v808_v33 }
 0x604   : > { %1767 = vmatmul.msk.f32.vlgmr.msrb.gmra.mxu2 %vm371_vm1, %v778_v32  ;;  %v1103_v36 = vsel %vm371_vm1, %v1959_v35, 0.0 }
 0x605   : > { %v1961_v37 = vpop.eup %1960  ;;  %1104 = vadd.xlane.f32.xlu1 %v1103_v36  ;;  %v1275_v38 = vpop.permute.xlu0 %1274  ;;  %953 = vmatpush.msra.mxu2 %v364_v34 }
 0x606   : > { %v1112_v39 = vsel %vm371_vm1, %v1961_v37, 0.0 }
 0x607   : > { %1794 = vmatpush.xpose.msk.msrb.mxu2 %vm371_vm1, %v1275_v38  ;;  %1113 = vadd.xlane.f32.xlu0 %v1112_v39 }
 0x60a   : > { %v1918_v40 = vpop.permute.xlu2 %1917 }
 0x60b   : > { %v1920_v44 = vunpack.i.h.bf16 %v1918_v40  ;;  %v1919_v45 = vunpack.i.l.bf16 %v1918_v40 }
 0x60c   : > { %1774 = vmatmul.msk.f32.vlgmr.msra.gmra.mxu2 %vm371_vm1, %v2390_v9 }
 0x610   : > { %v1913_v41 = vpop.permute.xlu1 %1912 }
 0x611   : > { %v1915_v42 = vunpack.i.h.bf16 %v1913_v41  ;;  %v1914_v43 = vunpack.i.l.bf16 %v1913_v41 }
 0x612   : > { %v1273_v9 = vpop.permute.xlu2 %1272 }
 0x613   : > { %1144 = vmatpush.msra.mxu3 %v1915_v42  ;;  %1170 = vmatpush.msra.mxu0 %v1914_v43 }
 0x614   : > { %1775 = vmatmul.msk.f32.gmra.mxu2 %vm371_vm1, %v2392_v10 }
 0x615   : > { %1196 = vmatpush.msrb.mxu3 %v1920_v44  ;;  %1222 = vmatpush.msrb.mxu0 %v1919_v45 }
 0x618   : > { %v1359_v46 = vpop.permute.xlu1 %1358 }
 0x619   : > { %1800 = vmatpush.xpose.msk.msra.mxu2 %vm371_vm1, %v1359_v46 }
 0x61a   : > { %v1331_v47 = vpop.permute.xlu2 %1330 }
 0x61c   : > { %1776 = vmatmul.msk.f32.gmra.mxu2 %vm371_vm1, %v2430_v50 }
 0x61e   : > { %1302 = vrot.lane.b32.xlu1 %v2327_v15, %s2165_s6  ;;  %s2098_s6 = scalar_lea.hbm %s2097_s30, 32 }
 0x61f   : > { %p2099_p1 = scmp.ne.s32.totalorder %s2097_s30, %s2098_s6 }
 0x621   : > { %p2100_p4 = pnand %p2099_p1, %p2273_p3 }
 0x622   : > { %v1357_v49 = vpop.permute.xlu2 %1356 }
 0x623   : > { %p2101_p8 = pneg %p2100_p4 }
 0x624   : > { %1777 = vmatmul.msk.f32.gmra.mxu2 %vm371_vm1, %v2394_v12 }
 0x62c   : > { %1795 = vmatmul.msk.f32.vlgmr.msrb.gmra.mxu2 %vm371_vm1, %v1273_v9 }
 0x630   : > { %v1087_v48 = vpop.xlane.xlu0 %1086 }
 0x631   : > { %v1093_v10 = vsub.f32 %v1048_v8, %v1087_v48 }
 0x633   : > { %v1099_v51 = vmul.f32 1.442695, %v1093_v10 }
 0x634   : > { %1801 = vmatmul.msk.f32.vlgmr.msra.gmra.mxu2 %vm371_vm1, %v1357_v49 }
 0x635   : > { %1962 = vpow2.f32 %v1099_v51  ;;  %v365_v51 = vld [vmem:[#allocation7 + $0x8] sm:$0xff] }
 0x63b   : > { %v1963_v52 = vpop.eup %1962 }
 0x63c   : > { %v1109_v50 = vsel %vm371_vm1, %v1963_v52, 0.0 }
 0x63d   : > { %1110 = vadd.xlane.f32.xlu0 %v1109_v50  ;;  %v366_v50 = vld [vmem:[#allocation7 + $0x10] sm:$0xff] }
 0x643   : > { %v1329_v53 = vpop.permute.xlu0 %1328 }
 0x651   : > { %1300 = vrot.lane.b32.xlu0 %v2327_v15, %s2167_s26  ;;  %s2102_s26 = scalar_lea.hbm %s2596_s5, 64 }
 0x652   : > { %p2104_p2 = scmp.lt.s32.totalorder %s2102_s26, %s2098_s6 }
 0x654   : > { %p2105_p9 = por %p2104_p2, %p2103_p11 }
 0x656   : > { %p2106_p10 = pnand %p2105_p9, %p2101_p8 }
 0x65b   : > { %v739_v5 = vpop.xlane.xlu2 %738 }
 0x65c   : > { %v749_v6 = vsub.f32 %v2396_v13, %v739_v5 }
 0x65e   : > { %v753_v8 = vmul.f32 1.442695, %v749_v6 }
 0x672   : > { %v1108_v54 = vpop.xlane.xlu0 %1107 }
 0x673   : > { %1964 = vrcp.f32 %v1108_v54 }
 0x678   : > { %v1105_v12 = vpop.xlane.xlu1 %1104 }
 0x679   : > { %v1965_v55 = vpop.eup %1964  ;;  %1966 = vrcp.f32 %v1105_v12 }
 0x67a   : > { %v1120_v56 = vmul.f32 %v1965_v55, %v1955_v27  ;;  %v1114_v57 = vpop.xlane.xlu0 %1113 }
 0x67b   : > { %1968 = vrcp.f32 %v1114_v57 }
 0x67c   : > { %1787 = vmatmul.msk.f32.vlgmr.msra.gmra.mxu0 %vm371_vm1, %v1120_v56  ;;  %1970 = vpow2.f32 %v753_v8 }
 0x67d   : > { %1798 = vmatpush.xpose.msk.msra.mxu0 %vm371_vm1, %v1331_v47 }
 0x67f   : > { %v1967_v58 = vpop.eup %1966 }
 0x680   : > { %v1119_v59 = vmul.f32 %v1967_v58, %v1959_v35 }
 0x681   : > { %v1969_v60 = vpop.eup %1968 }
 0x682   : > { %v1122_v61 = vmul.f32 %v1969_v60, %v1961_v37  ;;  %1786 = vmatmul.msk.f32.vlgmr.msra.gmra.mxu3 %vm371_vm1, %v1119_v59  ;;  %v1971_v16 = vpop.eup %1970 }
 0x683   : > { %v761_v24 = vsel %vm371_vm1, %v1971_v16, 0.0 }
 0x684   : > { %1789 = vmatmul.msk.f32.vlgmr.msrb.gmra.mxu0 %vm371_vm1, %v1122_v61 }
 0x687   : > { %v2492_v0 = vpop.f32.mrf.mxu2 }
 0x68c   : > { %1799 = vmatmul.msk.f32.vlgmr.msra.gmra.mxu0 %vm371_vm1, %v1329_v53 }
 0x68f   : > { %v2495_v1 = vpop.f32.mrf.mxu2 }
 0x690   : > { %v1303_v2 = vpop.permute.xlu1 %1302 }
 0x691   : > { %1796 = vmatpush.xpose.msk.msra.mxu3 %vm371_vm1, %v1303_v2 }
 0x697   : > { %v2498_v3 = vpop.f32.mrf.mxu2 }
 0x69f   : > { %v2500_v4 = vpop.f32.mrf.mxu2 }
 0x6a7   : > { %v2503_v7 = vpop.f32.mrf.mxu2 }
 0x6af   : > { %v1297_v11 = vpop.f32.mrf.mxu2 }
 0x6b0   : > { %v1111_v30 = vpop.xlane.xlu0 %1110  ;;  %v1384_v14 = vsel %vm371_vm1, %v1297_v11, -inf }
 0x6b1   : > { %1972 = vrcp.f32 %v1111_v30  ;;  %1385 = vmax.xlane.f32.xlu1 %v1384_v14 }
 0x6b7   : > { %v1973_v19 = vpop.eup %1972  ;;  %v1381_v21 = vpop.f32.mrf.mxu2 }
 0x6b8   : > { %v1121_v22 = vmul.f32 %v1973_v19, %v1963_v52  ;;  %v1393_v23 = vsel %vm371_vm1, %v1381_v21, -inf  ;;  %v1921_v52 = vpack.i.bf16 %v2332_v18, %v2330_v17 }
 0x6b9   : > { %1394 = vmax.xlane.f32.xlu2 %v1393_v23  ;;  %762 = vadd.xlane.f32.xlu1 %v761_v24 }
 0x6ba   : > { %1788 = vmatmul.msk.f32.vlgmr.msrb.gmra.mxu3 %vm371_vm1, %v1121_v22 }
 0x6c3   : > { %v1301_v13 = vpop.permute.xlu0 %1300 }
 0x6c4   : > { %1797 = vmatmul.msk.f32.vlgmr.msra.gmra.mxu3 %vm371_vm1, %v1301_v13 }
 0x6d1   : > { %781 = vrot.lane.b32.xlu2 %v2330_v17, %s2162_s15  ;;  %s1634_s15 = sshll.u32 %s277_s29, 4  ;;  %s1635_s15 = int_to_ptr.vmem [resolvable:$true] %s1634_s15 }
 0x6d9   : > { %1506 = vrot.lane.b32.xlu2 %v2335_v20, %s2168_s16 }
 0x6f9   : > { %v1172_v25 = vpop.f32.mrf.mxu0 }
 0x701   : > { %v1224_v26 = vpop.f32.mrf.mxu0 }
 0x705   : > { %v1146_v42 = vpop.f32.mrf.mxu3 }
 0x709   : > { %v1353_v27 = vpop.f32.mrf.mxu0 }
 0x70a   : > { %v1390_v28 = vsel %vm371_vm1, %v1353_v27, -inf }
 0x70b   : > { %1391 = vmax.xlane.f32.xlu0 %v1390_v28 }
 0x724   : > { %v1386_v29 = vpop.xlane.xlu1 %1385 }
 0x725   : > { %v1396_v31 = vsub.f32 %v1297_v11, %v1386_v29 }
 0x727   : > { %v1400_v32 = vmul.f32 1.442695, %v1396_v31 }
 0x729   : > { %1974 = vpow2.f32 %v1400_v32  ;;  %v1927_v32 = vld [vmem:[%s2595_s4] ss:$0 sm:$0xff] }
 0x72c   : > { %v763_v33 = vpop.xlane.xlu1 %762  ;;  %v1395_v34 = vpop.xlane.xlu2 %1394 }
 0x72d   : > { %1976 = vrcp.f32 %v763_v33  ;;  %v1399_v35 = vsub.f32 %v1381_v21, %v1395_v34 }
 0x72f   : > { %v1975_v36 = vpop.eup %1974  ;;  %v1406_v37 = vmul.f32 1.442695, %v1399_v35 }
 0x730   : > { %v1408_v38 = vsel %vm371_vm1, %v1975_v36, 0.0 }
 0x731   : > { %1978 = vpow2.f32 %v1406_v37  ;;  %1409 = vadd.xlane.f32.xlu1 %v1408_v38 }
 0x733   : > { %v1977_v20 = vpop.eup %1976 }
 0x734   : > { %v777_v39 = vmul.f32 %v1977_v20, %v1971_v16  ;;  %v782_v40 = vpop.permute.xlu2 %781  ;;  %v367_v16 = vld [vmem:[#allocation7 + $0x18] sm:$0xff] }
 0x735   : > { %802 = vmatpush.msra.mxu1 %v782_v40 }
 0x736   : > { %1766 = vmatmul.msk.f32.vlgmr.msra.gmra.mxu1 %vm371_vm1, %v777_v39 }
 0x737   : > { %v1979_v41 = vpop.eup %1978  ;;  %912 = vmatpush.msrb.mxu1 %v365_v51 }
 0x738   : > { %v1417_v43 = vsel %vm371_vm1, %v1979_v41, 0.0 }
 0x739   : > { %1418 = vadd.xlane.f32.xlu1 %v1417_v43  ;;  %1254 = vmatpush.msra.mxu1 %v366_v50 }
 0x73d   : > { %v1198_v44 = vpop.f32.mrf.mxu3 }
 0x747   : > { %v1325_v45 = vpop.f32.mrf.mxu3 }
 0x748   : > { %v1387_v46 = vsel %vm371_vm1, %v1325_v45, -inf }
 0x749   : > { %1388 = vmax.xlane.f32.xlu0 %v1387_v46 }
 0x77e   : > { %v1392_v9 = vpop.xlane.xlu0 %1391 }
 0x77f   : > { %v1398_v47 = vsub.f32 %v1353_v27, %v1392_v9 }
 0x781   : > { %v1404_v48 = vmul.f32 1.442695, %v1398_v47 }
 0x783   : > { %1980 = vpow2.f32 %v1404_v48 }
 0x789   : > { %v1981_v10 = vpop.eup %1980 }
 0x78a   : > { %v1414_v49 = vsel %vm371_vm1, %v1981_v10, 0.0 }
 0x78b   : > { %1415 = vadd.xlane.f32.xlu0 %v1414_v49 }
 0x79f   : > { %1922 = vrot.lane.b32.xlu0 %v1921_v52, %s2168_s16 }
 0x7a4   : > { %v1410_v18 = vpop.xlane.xlu1 %1409 }
 0x7ac   : > { %v1419_v58 = vpop.xlane.xlu1 %1418 }
 0x7b3   : > { %v804_v53 = vpop.f32.mrf.mxu1 }
 0x7b4   : > { %1770 = vmatmul.msk.f32.vlgmr.msrb.gmra.mxu1 %vm371_vm1, %v804_v53 }
 0x7bc   : > { %1771 = vmatmul.msk.f32.gmra.mxu1 %vm371_vm1, %v2492_v0  ;;  %v1389_v54 = vpop.xlane.xlu0 %1388 }
 0x7bd   : > { %v1397_v12 = vsub.f32 %v1325_v45, %v1389_v54 }
 0x7bf   : > { %v1402_v55 = vmul.f32 1.442695, %v1397_v12 }
 0x7c1   : > { %1982 = vpow2.f32 %v1402_v55 }
 0x7c2   : > { %1984 = vrcp.f32 %v1410_v18 }
 0x7c4   : > { %1772 = vmatmul.msk.f32.gmra.mxu1 %vm371_vm1, %v2442_v63 }
 0x7c7   : > { %v1983_v56 = vpop.eup %1982 }
 0x7c8   : > { %v1411_v17 = vsel %vm371_vm1, %v1983_v56, 0.0  ;;  %v1985_v57 = vpop.eup %1984 }
 0x7c9   : > { %1412 = vadd.xlane.f32.xlu1 %v1411_v17  ;;  %v1424_v0 = vmul.f32 %v1985_v57, %v1975_v36 }
 0x7cc   : > { %1773 = vmatmul.msk.f32.gmra.mxu1 %vm371_vm1, %v2440_v62 }
 0x7d4   : > { %1790 = vmatmul.msk.f32.vlgmr.msra.gmra.mxu1 %vm371_vm1, %v1146_v42 }
 0x7dc   : > { %1791 = vmatmul.msk.f32.gmra.mxu1 %vm371_vm1, %v1172_v25 }
 0x7e2   : > { %1454 = vrot.lane.b32.xlu1 %v2327_v15, %s2168_s16  ;;  %v1507_v15 = vpop.permute.xlu2 %1506 }
 0x7e4   : > { %1792 = vmatmul.msk.f32.gmra.mxu1 %vm371_vm1, %v1198_v44 }
 0x7ec   : > { %1793 = vmatmul.msk.f32.gmra.mxu1 %vm371_vm1, %v1224_v26 }
 0x7fe   : > { %v1416_v63 = vpop.xlane.xlu0 %1415 }
 0x7ff   : > { %1986 = vrcp.f32 %v1416_v63 }
 0x800   : > { %1988 = vrcp.f32 %v1419_v58 }
 0x805   : > { %v1987_v59 = vpop.eup %1986 }
 0x806   : > { %v1426_v2 = vmul.f32 %v1987_v59, %v1981_v10  ;;  %v1989_v5 = vpop.eup %1988 }
 0x807   : > { %v1427_v6 = vmul.f32 %v1989_v5, %v1979_v41 }
 0x811   : > { %v1923_v60 = vpop.permute.xlu0 %1922 }
 0x812   : > { %v1925_v62 = vunpack.i.h.bf16 %v1923_v60  ;;  %v1924_v61 = vunpack.i.l.bf16 %v1923_v60 }
 0x814   : > { %1449 = vmatpush.msrb.mxu3 %v1924_v61  ;;  %1501 = vmatpush.msrb.mxu2 %v1925_v62 }
 0x815   : > { %1802 = vmatmul.msk.f32.vlgmr.msrb.gmra.mxu3 %vm371_vm1, %v1424_v0  ;;  %1804 = vmatmul.msk.f32.vlgmr.msrb.gmra.mxu2 %vm371_vm1, %v1426_v2 }
 0x816   : > { %1527 = vmatpush.msra.mxu3 %v1507_v15  ;;  %1817 = vmatpush.msra.mxu2 %v367_v16 }
 0x81d   : > { %1805 = vmatmul.msk.f32.vlgmr.msra.gmra.mxu3 %vm371_vm1, %v1427_v6 }
 0x831   : > { %v914_v24 = vpop.f32.mrf.mxu1 }
 0x832   : > { %v956_v29 = vadd.f32 %v2495_v1, %v914_v24 }
 0x839   : > { %v917_v13 = vpop.f32.mrf.mxu1 }
 0x83a   : > { %v959_v46 = vadd.f32 %v2498_v3, %v917_v13 }
 0x83c   : > { %v1413_v8 = vpop.xlane.xlu1 %1412 }
 0x83d   : > { %1990 = vrcp.f32 %v1413_v8 }
 0x841   : > { %v920_v25 = vpop.f32.mrf.mxu1 }
 0x842   : > { %v962_v36 = vadd.f32 %v2500_v4, %v920_v25 }
 0x843   : > { %v1991_v11 = vpop.eup %1990 }
 0x844   : > { %v1425_v30 = vmul.f32 %v1991_v11, %v1983_v56 }
 0x849   : > { %v923_v26 = vpop.f32.mrf.mxu1 }
 0x84a   : > { %v965_v1 = vadd.f32 %v2503_v7, %v923_v26 }
 0x851   : > { %v1256_v27 = vpop.f32.mrf.mxu1 }
 0x852   : > { %v1268_v31 = vadd.f32 %v1256_v27, %v956_v29 }
 0x854   : > { %v1455_v14 = vpop.permute.xlu1 %1454 }
 0x855   : > { %1475 = vmatpush.msrb.mxu0 %v1455_v14 }
 0x856   : > { %1803 = vmatmul.msk.f32.vlgmr.msrb.gmra.mxu0 %vm371_vm1, %v1425_v30 }
 0x857   : > { %1559 = vmatpush.msra.mxu0 %v367_v16 }
 0x859   : > { %v1259_v28 = vpop.f32.mrf.mxu1 }
 0x85a   : > { %v1269_v9 = vadd.f32 %v1259_v28, %v959_v46 }
 0x861   : > { %v1262_v33 = vpop.f32.mrf.mxu1 }
 0x862   : > { %v1270_v38 = vadd.f32 %v1262_v33, %v962_v36 }
 0x869   : > { %v1265_v41 = vpop.f32.mrf.mxu1 }
 0x86a   : > { %v1271_v42 = vadd.f32 %v1265_v41, %v965_v1 }
 0x898   : > { %v1451_v19 = vpop.f32.mrf.mxu3  ;;  %v1503_v21 = vpop.f32.mrf.mxu2 }
 0x899   : > { %1806 = vmatmul.msk.f32.vlgmr.msra.gmra.mxu0 %vm371_vm1, %v1451_v19  ;;  %1808 = vmatmul.msk.f32.vlgmr.msra.gmra.mxu2 %vm371_vm1, %v1503_v21 }
 0x8a0   : > { %v1529_v22 = vpop.f32.mrf.mxu3 }
 0x8a1   : > { %1809 = vmatmul.msk.f32.gmra.mxu2 %vm371_vm1, %v1529_v22 }
 0x8d3   : > { %v1477_v23 = vpop.f32.mrf.mxu0 }
 0x8d4   : > { %1807 = vmatmul.msk.f32.gmra.mxu0 %vm371_vm1, %v1477_v23 }
 0x916   : > { %v1561_v34 = vpop.f32.mrf.mxu0 }
 0x917   : > { %v1573_v35 = vadd.f32 %v1561_v34, %v1268_v31 }
 0x919   : > { %v1581_v37 = vadd.f32 %v1927_v32, %v1573_v35 }
 0x91b   : > { %1585 = vxpose.xlu2.b32.start [1/4] (short) (narrow) %v1581_v37, 32 }
 0x91c   : > { %v1567_v20 = vpop.f32.mrf.mxu2 }
 0x91d   : > { %v1575_v39 = vadd.f32 %v1567_v20, %v1270_v38 }
 0x91f   : > { %v1583_v40 = vadd.f32 %v1927_v32, %v1575_v39 }
 0x924   : > { %v1570_v43 = vpop.f32.mrf.mxu2 }
 0x925   : > { %v1576_v44 = vadd.f32 %v1570_v43, %v1271_v42 }
 0x927   : > { %v1584_v45 = vadd.f32 %v1927_v32, %v1576_v44 }
 0x951   : > { %v1564_v47 = vpop.f32.mrf.mxu0 }
 0x952   : > { %v1574_v4 = vadd.f32 %v1564_v47, %v1269_v9 }
 0x954   : > { %v1582_v48 = vadd.f32 %v1927_v32, %v1574_v4 }
 0x956   : > { %1586 = vxpose.xlu2.b32.cont [2/4] (short) (narrow) %v1582_v48, 32 }
 0x95e   : > { %1587 = vxpose.xlu2.b32.cont [3/4] (short) (narrow) %v1583_v40, 32 }
 0x966   : > { %1588 = vxpose.xlu2.b32.end [4/4] (short) (narrow) %v1584_v45, 32 }
 0x9e7   : > { %v1601_v10 = vpop.trf.xlu2 }
 0x9e8   : > { %1617 = vst.msk [vmem:[%s277_s29] sm:$0xff] %vm322_vm0, %v1601_v10 }
 0x9ef   : > { %v1602_v7 = vpop.trf.xlu2 }
 0x9f0   : > { %1618 = vst.msk [vmem:[%s277_s29 + $0x8] sm:$0xff] %vm322_vm0, %v1602_v7 }
 0x9f7   : > { %v1603_v49 = vpop.trf.xlu2 }
 0x9f8   : > { %1619 = vst.msk [vmem:[%s277_s29 + $0x10] sm:$0xff] %vm322_vm0, %v1603_v49 }
 0x9ff   : > { %v1604_v3 = vpop.trf.xlu2 }
 0xa00   : > { %1620 = vst.msk [vmem:[%s277_s29 + $0x18] sm:$0xff] %vm322_vm0, %v1604_v3 }
 0xa01   : > { %2109 = shalt.err (!%p2106_p10)
}
 0xa02   : > { %s2169_s8 = smov 128   ;;  %s2170_s24 = smov 8  }
 0xa03   : > { %1828 = dma.vmem_to_hbm [thread:$0]  (%p2273_p3), %s1635_s15, 512, %s1637_s27, %s1622_s10, %s2169_s8, %s2169_s8, %s2170_s24  }
 0xa04 PF: > { %s1651_s29 = sand.u32 1, %s2140_s18   ;;  %p2604_p12 = scmp.ge.s32.totalorder %s2152_s21, 2 }
 0xa05   : > { %s1652_s11 = scalar_lea.sflag [#allocation4], %s1651_s29 }
 0xa06   : > { %p1842_p13 = pnand %p2604_p12, %p2236_p6 }
 0xa08   : > { %p1843_p0 = pneg %p1842_p13 }
 0xa0a   : > { %2135 = dma.done.wait (%p1843_p0), %s1652_s11, 512  }
 0xa0b   : > { %2137 = vsyncadd (%p1843_p0), %s1652_s11, 4294966784  ;;  %p19_p5 = scmp.ge.s32.totalorder %s2263_s14, 4   ;;  %s2605_s18 = smov %s2144_s19 }
 0xa0c   : > { %s2606_s19 = smov %s2148_s20  ;;  %s2607_s20 = smov %s2279_s23 }
 0xa0d   : > { %s2608_s21 = smov %s2263_s14  ;;  %21 = sbr.rel (!%p19_p5) target bundleno = 6 (0x6), region = 93 }
 0xa12   :  { %1658 = vsyncpa [#allocation3], 1 }
 0xa13   :  { %1660 = vsyncpa [#allocation3 + $0x1], 1 }
 0xa14   :  { %1661 = vsyncpa [#allocation6], 1 }
 0xa15   :  { %1662 = vsyncpa [#allocation4], 1 }
 0xa16   :  { %1664 = vsyncpa [#allocation4 + $0x1], 1 }

</bundles_post_ra>
